<compile_context>
chip_gen: v7x
topology: tpu7x:2x2x1
jax: 0.10.0
libtpu: 0.0.40
codegen_flags: <defaults>
</compile_context>

<pallas_src>
import functools

import jax
import jax.numpy as jnp
from jax.experimental import pallas as pl
from jax.experimental.pallas import tpu as pltpu


def _round_up(a, m):
    return ((a + m - 1) // m) * m


def _upsample_kernel(x_ref, w_ref, b_ref, o_ref):
    """One (sample, row-group) tile of ConvTranspose2d(k=2, s=2).

    x_ref: (1, Cin, P)      NCHW slab, channels on the sublane axis, P = rows*W pixels
    w_ref: (Cin, 4*Cout)    columns ordered (kh, kw, cout)
    b_ref: (1, 4*Cout)      float32 bias tiled over (kh, kw)
    o_ref: (1, P, 4*Cout)   per-pixel sub-pixel outputs, one dense store
    """
    y = jax.lax.dot_general(
        x_ref[0], w_ref[...],
        dimension_numbers=(((0,), (0,)), ((), ())),   # contract over Cin
        preferred_element_type=jnp.float32,           # f32 accumulation on the MXU
    )                                                 # (P, 4*Cout)
    o_ref[0] = (y + b_ref[...]).astype(o_ref.dtype)   # f32 bias epilogue, single store


def _vmem_capacity_bytes():
    try:
        return int(pltpu.get_tpu_info().vmem_capacity_bytes)
    except Exception:
        return 64 * 1024 * 1024   # conservative (v7x per-core size); safe on v5e/v6e


def _tile_bytes(rows, W, Cin, Cout, in_item, out_item, w_item):
    """Conservative VMEM estimate for one grid step (double-buffered blocks)."""
    p = rows * W
    x_b = _round_up(Cin, 8) * _round_up(p, 128) * in_item
    o_b = _round_up(p, 8) * _round_up(4 * Cout, 128) * out_item
    w_b = _round_up(Cin, 8) * _round_up(4 * Cout, 128) * w_item
    b_b = 8 * _round_up(4 * Cout, 128) * 4
    acc = _round_up(p, 8) * _round_up(4 * Cout, 128) * 4   # f32 matmul result
    return 2 * (x_b + o_b + w_b + b_b) + acc


def _pick_rows(N, H, W, Cin, Cout, in_item, out_item, w_item, budget_bytes):
    """Largest row-group (divisor of H) whose tiles fit the VMEM budget, with lane
    alignment ((rows*W) % 128 == 0 or full H), while keeping >= 8 grid steps when a
    smaller, still-aligned candidate allows it (pipelining + megacore)."""
    candidates = [r for r in range(1, H + 1)
                  if H % r == 0 and (r == H or (r * W) % 128 == 0)]
    fitting = [r for r in candidates
               if _tile_bytes(r, W, Cin, Cout, in_item, out_item, w_item) <= budget_bytes]
    if not fitting:
        fitting = [min(candidates)]
    max_steps = max(N * (H // r) for r in fitting)
    target_steps = min(8, max_steps)
    ok = [r for r in fitting if N * (H // r) >= target_steps]
    return max(ok)


@functools.partial(jax.jit, static_argnames=("output_size", "compute_dtype"))
def upsample_block_forward(x_nchw, weight, bias, output_size, compute_dtype=None):
    """ConvTranspose2d(k=2, s=2) forward.

    x_nchw: (N, Cin, H, W)
    weight: (Cin, Cout, 2, 2)   -- PyTorch ConvTranspose2d weight layout
    bias:   (Cout,)
    output_size: (..., H_out, W_out) with H_out in [2H, 2H+1], W_out in [2W, 2W+1]
    compute_dtype: optional streaming dtype (e.g. jnp.bfloat16) for x / weight;
                   accumulation stays f32.  None -> use x.dtype (matches PyTorch f32).
    returns: (N, Cout, H_out, W_out)
    """
    N, Cin, H, W = x_nchw.shape
    Cin_w, Cout, kH, kW = weight.shape
    assert Cin == Cin_w and kH == 2 and kW == 2

    H_out, W_out = int(output_size[-2]), int(output_size[-1])
    pad_h = H_out - 2 * H
    pad_w = W_out - 2 * W
    assert 0 <= pad_h <= 1 and 0 <= pad_w <= 1, "invalid output_size for k=2, s=2"

    out_dtype = x_nchw.dtype
    cd = jnp.dtype(compute_dtype) if compute_dtype is not None else jnp.dtype(out_dtype)

    # weight (Cin, Cout, 2, 2) -> (Cin, (kh, kw, cout)); streamed in the compute dtype.
    w_flat = jnp.transpose(weight, (0, 2, 3, 1)).reshape(Cin, 4 * Cout).astype(cd)
    b_flat = jnp.tile(bias.astype(jnp.float32), (4,))[None, :]        # (1, 4*Cout) f32
    x3 = x_nchw.astype(cd).reshape(N, Cin, H * W)     # free reshape; stays NCHW in HBM

    # Per-generation tile sizing.
    vmem_cap = _vmem_capacity_bytes()
    budget = (vmem_cap * 3) // 8
    in_item = cd.itemsize
    out_item = jnp.dtype(out_dtype).itemsize
    rows = _pick_rows(N, H, W, Cin, Cout, in_item, out_item, in_item, budget)
    est = _tile_bytes(rows, W, Cin, Cout, in_item, out_item, in_item)
    vmem_limit = int(min(vmem_cap * 7 // 8,
                         max(32 * 1024 * 1024, est + est // 4)))
    if est > vmem_limit:
        raise ValueError(
            f"upsample tile needs ~{est} B of VMEM but only {vmem_limit} B is available "
            f"on this chip ({vmem_cap} B total); reduce W or the channel counts")

    grid = (N, H // rows)
    flops = 2 * N * H * W * Cin * 4 * Cout
    bytes_accessed = (x3.size * in_item + w_flat.size * in_item + b_flat.size * 4
                      + N * H * W * 4 * Cout * out_item)

    y = pl.pallas_call(
        _upsample_kernel,
        out_shape=jax.ShapeDtypeStruct((N, H * W, 4 * Cout), out_dtype),
        grid_spec=pltpu.PrefetchScalarGridSpec(
            num_scalar_prefetch=0,
            grid=grid,
            in_specs=[
                pl.BlockSpec((1, Cin, rows * W), lambda n, h: (n, 0, h)),
                pl.BlockSpec((Cin, 4 * Cout), lambda n, h: (0, 0)),
                pl.BlockSpec((1, 4 * Cout), lambda n, h: (0, 0)),
            ],
            out_specs=pl.BlockSpec((1, rows * W, 4 * Cout), lambda n, h: (n, h, 0)),
        ),
        compiler_params=pltpu.CompilerParams(
            dimension_semantics=("parallel", "parallel"),
            vmem_limit_bytes=vmem_limit,
        ),
        cost_estimate=pl.CostEstimate(
            flops=flops, transcendentals=0, bytes_accessed=bytes_accessed),
    )(x3, w_flat, b_flat)

    # (N, H*W, (kh, kw, c)) -> (N, Cout, 2H, 2W): the single remaining XLA pass over the
    # output (see header note / TODO about fusing this permute in-kernel).
    y6 = y.reshape(N, H, W, 2, 2, Cout)
    core = jnp.transpose(y6, (0, 5, 1, 3, 2, 4)).reshape(N, Cout, 2 * H, 2 * W)

    if pad_h or pad_w:
        # output_padding strip receives the bias (PyTorch semantics), via one
        # bias-broadcast + slice-set instead of two full-output concatenates.
        full = jnp.broadcast_to(bias.astype(out_dtype)[None, :, None, None],
                                (N, Cout, H_out, W_out))
        return full.at[:, :, :2 * H, :2 * W].set(core)
    return core


def _reference_convtranspose2d(x, weight, bias, H_out, W_out):
    """Pure-JAX reference for ConvTranspose2d(k=2, s=2) with optional output_padding."""
    N, Cin, H, W = x.shape
    _, Cout, _, _ = weight.shape
    # out[n, oc, 2h+i, 2w+j] = sum_ic x[n,ic,h,w] * weight[ic,oc,i,j] + bias[oc]
    contrib = jnp.einsum("nchw,cdij->ndhiwj", x, weight).reshape(N, Cout, 2 * H, 2 * W)
    out = jnp.broadcast_to(bias[None, :, None, None],
                           (N, Cout, H_out, W_out)).astype(jnp.float32)
    out = out.at[:, :, :2 * H, :2 * W].add(contrib)
    return out


if __name__ == "__main__":
    key = jax.random.PRNGKey(0)
    k_x, k_w, k_b = jax.random.split(key, 3)

    N, Cin, Cout, H, W = 2, 4, 4, 16, 16
    x = jax.random.normal(k_x, (N, Cin, H, W), dtype=jnp.float32)
    weight = jax.random.normal(k_w, (Cin, Cout, 2, 2), dtype=jnp.float32) * 0.1
    bias = jax.random.normal(k_b, (Cout,), dtype=jnp.float32) * 0.1

    # Exact output size (output_padding = 0).
    out = upsample_block_forward(x, weight, bias, output_size=(N, Cout, 2 * H, 2 * W))
    out = jax.block_until_ready(out)
    ref = _reference_convtranspose2d(x, weight, bias, 2 * H, 2 * W)
    assert out.shape == (N, Cout, 2 * H, 2 * W), out.shape
    err = float(jnp.max(jnp.abs(out - ref)))
    assert err < 1e-4, err

    # output_size one larger in each spatial dim (output_padding = 1): the extra
    # row/column must contain the bias, not zeros.
    out_p = upsample_block_forward(x, weight, bias, output_size=(2 * H + 1, 2 * W + 1))
    out_p = jax.block_until_ready(out_p)
    ref_p = _reference_convtranspose2d(x, weight, bias, 2 * H + 1, 2 * W + 1)
    assert out_p.shape == (N, Cout, 2 * H + 1, 2 * W + 1), out_p.shape
    err_p = float(jnp.max(jnp.abs(out_p - ref_p)))
    assert err_p < 1e-4, err_p

    # bf16-streaming path (halves x/weight HBM traffic, keeps f32 accumulation).
    out_b = upsample_block_forward(x, weight, bias,
                                   output_size=(N, Cout, 2 * H, 2 * W),
                                   compute_dtype=jnp.bfloat16)
    out_b = jax.block_until_ready(out_b)
    err_b = float(jnp.max(jnp.abs(out_b - ref)))
    assert err_b < 5e-2, err_b

    print("KERNEL_OK")
</pallas_src>

<mosaic_0001>
module attributes {stable_mosaic.version = 11 : i64} {
  func.func @_upsample_kernel(%arg0: i32, %arg1: i32, %arg2: memref<1x4x128xf32, #tpu.memory_space<vmem>>, %arg3: memref<4x16xf32, #tpu.memory_space<vmem>>, %arg4: memref<1x16xf32, #tpu.memory_space<vmem>>, %arg5: memref<1x128x16xf32, #tpu.memory_space<vmem>>) attributes {dimension_semantics = [#tpu.dimension_semantics<parallel>, #tpu.dimension_semantics<parallel>], iteration_bounds = array<i64: 2, 2>, scalar_prefetch = 0 : i64, scratch_operands = 0 : i64, tpu.core_type = #tpu.core_type<tc>, window_params = [{transform_indices = @transform_0, window_bounds = array<i64: 1, 4, 128>}, {pipeline_mode = #tpu.pipeline_mode<synchronous>, transform_indices = @transform_1, window_bounds = array<i64: 4, 16>}, {pipeline_mode = #tpu.pipeline_mode<synchronous>, transform_indices = @transform_2, window_bounds = array<i64: 1, 16>}, {transform_indices = @transform_3, window_bounds = array<i64: 1, 128, 16>}]} {
    %c0 = arith.constant 0 : index
    %c0_0 = arith.constant 0 : index
    %c0_1 = arith.constant 0 : index
    %0 = vector.load %arg2[%c0, %c0_0, %c0_1] : memref<1x4x128xf32, #tpu.memory_space<vmem>>, vector<1x4x128xf32>
    %1 = vector.shape_cast %0 : vector<1x4x128xf32> to vector<4x128xf32>
    %c0_2 = arith.constant 0 : index
    %c0_3 = arith.constant 0 : index
    %2 = vector.load %arg3[%c0_2, %c0_3] : memref<4x16xf32, #tpu.memory_space<vmem>>, vector<4x16xf32>
    %cst = arith.constant dense<0.000000e+00> : vector<128x16xf32>
    %3 = tpu.matmul %1, %2, %cst {dimension_numbers = #tpu.dot_dimension_numbers<[0], [0], [1], [1], [0, 1, 1, 1], [], []>} : vector<4x128xf32>, vector<4x16xf32>, vector<128x16xf32> -> vector<128x16xf32>
    %c0_4 = arith.constant 0 : index
    %c0_5 = arith.constant 0 : index
    %4 = vector.load %arg4[%c0_4, %c0_5] : memref<1x16xf32, #tpu.memory_space<vmem>>, vector<1x16xf32>
    %5 = vector.broadcast %4 : vector<1x16xf32> to vector<128x16xf32>
    %6 = arith.addf %3, %5 : vector<128x16xf32>
    %c0_6 = arith.constant 0 : index
    %c0_7 = arith.constant 0 : index
    %c0_8 = arith.constant 0 : index
    %7 = vector.load %arg5[%c0_6, %c0_7, %c0_8] : memref<1x128x16xf32, #tpu.memory_space<vmem>>, vector<1x128x16xf32>
    %8 = vector.shape_cast %7 : vector<1x128x16xf32> to vector<128x16xf32>
    %9 = vector.shape_cast %6 : vector<128x16xf32> to vector<1x128x16xf32>
    tpu.vector_store %arg5[%c0_6, %c0_7, %c0_8], %9 {strides = array<i32>} : memref<1x128x16xf32, #tpu.memory_space<vmem>>, vector<1x128x16xf32>,
    return
  }
  func.func @transform_0(%arg0: i32, %arg1: i32) -> (i32, i32, i32) {
    %c0_i32 = arith.constant 0 : i32
    %c0_i32_0 = arith.constant 0 : i32
    return %arg0, %c0_i32, %arg1 : i32, i32, i32
  }
  func.func @transform_1(%arg0: i32, %arg1: i32) -> (i32, i32) {
    %c0_i32 = arith.constant 0 : i32
    %c0_i32_0 = arith.constant 0 : i32
    %c0_i32_1 = arith.constant 0 : i32
    return %c0_i32, %c0_i32_0 : i32, i32
  }
  func.func @transform_2(%arg0: i32, %arg1: i32) -> (i32, i32) {
    %c0_i32 = arith.constant 0 : i32
    %c0_i32_0 = arith.constant 0 : i32
    %c0_i32_1 = arith.constant 0 : i32
    return %c0_i32, %c0_i32_0 : i32, i32
  }
  func.func @transform_3(%arg0: i32, %arg1: i32) -> (i32, i32, i32) {
    %c0_i32 = arith.constant 0 : i32
    %c0_i32_0 = arith.constant 0 : i32
    return %arg0, %arg1, %c0_i32 : i32, i32, i32
  }
}

</mosaic_0001>

<bundles_post_ra>
// kernel: tile.9
= control target key start
LH: loop header
LB: loop body
LE: loop exit
PB: predicated region body
PF: predicated region fallthrough
CT: control target
= control target key end

     0   :  { %vm7_vm0 = vcmask 31744   ;;  %s37_s8 = smov 4   ;;  %s38_s9 = smov 8   ;;  %vm13_vm1 = vcmask 130144   ;;  %vm19_vm2 = vcmask 97344   ;;  %vm25_vm3 = vcmask 64544   ;;  %s55_s0 = inlined_call_operand.vmem [shape: f32[4,4], index: 0, kind: input, shape index: {}]   ;;  %s56_s1 = inlined_call_operand.vmem [shape: f32[1,16], index: 1, kind: output, shape index: {}]  }
   0x1   :  { %v4_v0 = vld [vmem:[%s55_s0] sm:$0xf]  ;;  %s36_s0 = smov 12  }
   0x2   :  { %5 = vst [vmem:[#allocation1] sm:$0xf] %v4_v0 }
   0x9   :  { %v10_v1 = vld [vmem:[#allocation1 + $0x3] sm:$0x1]   ;;  %v22_v2 = vld [vmem:[#allocation1 + $0x1] sm:$0x1]   ;;  %v6_v3 = vld [vmem:[#allocation1] sm:$0x1]  }
   0xa   :  { %11 = vrot.lane.b32.xlu0 %v10_v1, %s36_s0  ;;  %23 = vrot.lane.b32.xlu1 %v22_v2, %s37_s8  ;;  %v16_v4 = vld [vmem:[#allocation1 + $0x2] sm:$0x1]   ;;  %8 = vst.msk [vmem:[#allocation0] sm:$0x1] %vm7_vm0, %v6_v3  }
   0xe   :  { %17 = vrot.lane.b32.xlu0 %v16_v4, %s38_s9 }
  0x7c   :  { %v12_v5 = vpop.permute.xlu0 %11   ;;  %v24_v6 = vpop.permute.xlu1 %23  }
  0x7d   :  { %14 = vst.msk [vmem:[#allocation0] sm:$0x1] %vm13_vm1, %v12_v5  }
  0x80   :  { %v18_v7 = vpop.permute.xlu0 %17  }
  0x81   :  { %20 = vst.msk [vmem:[#allocation0] sm:$0x1] %vm19_vm2, %v18_v7  }
  0x82   :  { %26 = vst.msk [vmem:[#allocation0] sm:$0x1] %vm25_vm3, %v24_v6  }
  0x89   :  { %v30_v8 = vld [vmem:[#allocation0] sm:$0x1] }
  0x8a   :  { %32 = vst [vmem:[%s56_s1] sm:$0x1] %v30_v8 }

// kernel: tile.8
= control target key start
LH: loop header
LB: loop body
LE: loop exit
PB: predicated region body
PF: predicated region fallthrough
CT: control target
= control target key end

     0   :  { %s22_s0 = inlined_call_operand.vmem [shape: f32[4], index: 0, kind: input, shape index: {}]   ;;  %s23_s1 = inlined_call_operand.vmem [shape: f32[4,4], index: 1, kind: output, shape index: {}]  }
   0x1   :  { %v4_v0 = vld [vmem:[%s22_s0] ss:$0 sm:$0xff] }
   0x2   :  { %5 = vst [vmem:[%s23_s1] sm:$0xf] %v4_v0 }

// kernel: upsample_block_forward.1
= control target key start
LH: loop header
LB: loop body
LE: loop exit
PB: predicated region body
PF: predicated region fallthrough
CT: control target
= control target key end

     0   :  { %s727_s12 = smov 0   ;;  %s729_s13 = smov 0   ;;  %s843_s0 = inlined_call_operand.vmem [shape: f32[2,4,256], index: 0, kind: input, shape index: {}]   ;;  %s844_s1 = inlined_call_operand.vmem [shape: f32[4,16], index: 1, kind: input, shape index: {}]   ;;  %s845_s2 = inlined_call_operand.vmem [shape: f32[1,16], index: 2, kind: input, shape index: {}]   ;;  %s846_s3 = inlined_call_operand.vmem [shape: f32[2,256,16], index: 3, kind: output, shape index: {}]  }
   0x1   :  { %s731_s14 = smov 0   ;;  %s733_s15 = smov 0  }
   0x2   :  { %s735_s16 = smov 0  }
   0x3 LB: > { %s22_s17 = sadd.s32 1, %s697_s14  ;;  %s25_s18 = sadd.s32 1, %s701_s15  ;;  %s705_s16 = sphi %s735_s16, %s13_s16   ;;  %s701_s15 = sphi %s733_s15, %s850_s15   ;;  %s697_s14 = sphi %s731_s14, %s849_s14   ;;  %s693_s13 = sphi %s729_s13, %s848_s13   ;;  %s689_s12 = sphi %s727_s12, %s847_s12  }
   0x4   : > { %p23_p0 = scmp.ge.s32.totalorder %s22_s17, 2  ;;  %p555_p1 = scmp.ge.s32.totalorder %s705_s16, 1 }
   0x5   : > { %p156_p2 = scmp.lt.s32.totalorder %s705_s16, 5 }
   0x6   : > { %s852_s17 = smov (%p23_p0, %s22_s17), 0  ;;  %s854_s18 = smov (!%p23_p0, %s25_s18), %s701_s15 }
   0x7   : > { %p157_p3 = pnand %p555_p1, %p156_p2  ;;  %p27_p4 = scmp.ge.s32.totalorder %s854_s18, 2 }
   0x8   : > { %p187_p5 = scmp.lt.s32.totalorder (!%p157_p3), %s693_s13, 1  ;;  %p189_p6 = scmp.lt.s32.totalorder (!%p157_p3), %s689_s12, 1  ;;  %v206_v1 = vld [vmem:[%s844_s1] sm:$0xf] (!%p157_p3)  ;;  %vm295_vm0 = vcmask (!%p157_p3), 1043456   ;;  %vm246_vm1 = vcmask (!%p157_p3), 31744  }
   0x9   : > { %s856_s18 = smov (%p27_p4, %s854_s18), 0  ;;  %160 = sbr.rel (%p157_p3) target bundleno = 428 (0x1ac), region = 32 }
   0xa   : > { %598 = vmatprep.subr.msk.mxu0 (!%p157_p3), %vm295_vm0, %v206_v1  ;;  %624 = vmatprep.subr.msk.mxu1 (!%p157_p3), %vm295_vm0, %v206_v1  ;;  %s558_s28 = sshll.u32 (!%p157_p3), %s689_s12, 4  ;;  %v561_v18 = vld [vmem:[%s845_s2] ss:$0 sm:$0xff] (!%p157_p3)  ;;  %vm444_vm2 = vcmask (!%p157_p3), 130048  }
   0xb   : > { %599 = vmatpush3.msk.msra.mxu0 (!%p157_p3), %vm295_vm0, %v206_v1  ;;  %625 = vmatpush3.msk.msra.mxu1 (!%p157_p3), %vm295_vm0, %v206_v1  ;;  %p198_p7 = scmp.lt.s32.totalorder (!%p157_p3), %s558_s28, 31 }
  0x10   : > { %s858_s13 = smov (!%p187_p5, %s693_s13), 1  ;;  %s860_s28 = smov (!%p198_p7, %s558_s28), 31 }
  0x11   : > { %s190_s19 = scalar_select %p189_p6, %s689_s12, 1 }
  0x12   : > { %s556_s20 = sshll.u32 %s858_s13, 1  ;;  %s559_s29 = sshll.u32 %s858_s13, 5 }
  0x13   : > { %s192_s21 = sadd.s32 %s556_s20, %s190_s19  ;;  %s201_s30 = sadd.s32 %s559_s29, %s860_s28 }
  0x14   : > { %s557_s22 = sshll.u32 %s192_s21, 2  ;;  %s560_s4 = sshll.u32 %s201_s30, 3 }
  0x15   : > { %s194_s25 = scalar_lea.vmem %s843_s0, %s557_s22  ;;  %s794_s9 = scalar_lea.vmem %s846_s3, %s560_s4 }
  0x16   : > { %v205_v0 = vld [vmem:[%s194_s25] sm:$0xf] }
  0x17   : > { %214 = vxpose.xlu0.b32.start.end [1/1] (short) %v205_v0, 128 }
  0x97   : > { %v230_v2 = vpop.trf.xlu0 }
  0x98   : > { %600 = vmatprep.mubr.msk.f32.mxu0 %vm246_vm1, %v230_v2 }
  0x9b   : > { %v231_v3 = vpop.trf.xlu0 }
  0x9c   : > { %601 = vmatmul.mubr.msk.f32.vlgmr.msra.gmra.mrb[0].mxu0 %vm246_vm1, %v231_v3 }
  0x9f   : > { %v232_v4 = vpop.trf.xlu0 }
  0xa0   : > { %603 = vmatprep.mubr.msk.f32.mxu0 %vm246_vm1, %v232_v4 }
  0xa3   : > { %v233_v5 = vpop.trf.xlu0 }
  0xa4   : > { %604 = vmatmul.mubr.msk.f32.gmra.mrb[2].mxu0 %vm246_vm1, %v233_v5 }
  0xa7   : > { %v234_v6 = vpop.trf.xlu0 }
  0xa8   : > { %606 = vmatprep.mubr.msk.f32.mxu0 %vm246_vm1, %v234_v6 }
  0xab   : > { %v235_v7 = vpop.trf.xlu0 }
  0xac   : > { %607 = vmatmul.mubr.msk.f32.gmra.mrb[4].mxu0 %vm246_vm1, %v235_v7 }
  0xaf   : > { %v236_v8 = vpop.trf.xlu0 }
  0xb0   : > { %609 = vmatprep.mubr.msk.f32.mxu0 %vm246_vm1, %v236_v8 }
  0xb3   : > { %v237_v9 = vpop.trf.xlu0 }
  0xb4   : > { %610 = vmatmul.mubr.msk.f32.gmra.mrb[6].mxu0 %vm246_vm1, %v237_v9 }
  0xb7   : > { %v238_v10 = vpop.trf.xlu0 }
  0xb8   : > { %612 = vmatprep.mubr.msk.f32.mxu1 %vm246_vm1, %v238_v10 }
  0xbb   : > { %v239_v11 = vpop.trf.xlu0 }
  0xbc   : > { %613 = vmatmul.mubr.msk.f32.vlgmr.msra.gmra.mrb[0].mxu1 %vm246_vm1, %v239_v11 }
  0xbf   : > { %v240_v12 = vpop.trf.xlu0 }
  0xc0   : > { %615 = vmatprep.mubr.msk.f32.mxu1 %vm246_vm1, %v240_v12 }
  0xc3   : > { %v241_v13 = vpop.trf.xlu0 }
  0xc4   : > { %616 = vmatmul.mubr.msk.f32.gmra.mrb[2].mxu1 %vm246_vm1, %v241_v13 }
  0xc7   : > { %v242_v14 = vpop.trf.xlu0 }
  0xc8   : > { %618 = vmatprep.mubr.msk.f32.mxu1 %vm246_vm1, %v242_v14 }
  0xcb   : > { %v243_v15 = vpop.trf.xlu0 }
  0xcc   : > { %619 = vmatmul.mubr.msk.f32.gmra.mrb[4].mxu1 %vm246_vm1, %v243_v15 }
  0xcf   : > { %v244_v16 = vpop.trf.xlu0 }
  0xd0   : > { %621 = vmatprep.mubr.msk.f32.mxu1 %vm246_vm1, %v244_v16 }
  0xd3   : > { %v245_v17 = vpop.trf.xlu0 }
  0xd4   : > { %622 = vmatmul.mubr.msk.f32.gmra.mrb[6].mxu1 %vm246_vm1, %v245_v17 }
 0x16f   : > { %v602_v19 = vpop.f32.mrb[0].mxu0 }
 0x170   : > { %v371_v20 = vadd.f32 %v602_v19, %v561_v18  ;;  %v365_v21 = vpop.f32.mrb[1].mxu0 }
 0x171   : > { %v366_v22 = vadd.f32 %v561_v18, %v365_v21 }
 0x172   : > { %446 = vst.msk [vmem:[%s794_s9 + $0x8] sm:$0xff] %vm444_vm2, %v371_v20 }
 0x173   : > { %445 = vst.msk [vmem:[%s794_s9] sm:$0xff] %vm444_vm2, %v366_v22 }
 0x177   : > { %v605_v23 = vpop.f32.mrb[2].mxu0 }
 0x178   : > { %v381_v24 = vadd.f32 %v605_v23, %v561_v18  ;;  %v375_v25 = vpop.f32.mrb[3].mxu0 }
 0x179   : > { %v376_v26 = vadd.f32 %v561_v18, %v375_v25 }
 0x17a   : > { %448 = vst.msk [vmem:[%s794_s9 + $0x18] sm:$0xff] %vm444_vm2, %v381_v24 }
 0x17b   : > { %447 = vst.msk [vmem:[%s794_s9 + $0x10] sm:$0xff] %vm444_vm2, %v376_v26 }
 0x17f   : > { %v608_v27 = vpop.f32.mrb[4].mxu0 }
 0x180   : > { %v391_v28 = vadd.f32 %v608_v27, %v561_v18  ;;  %v385_v29 = vpop.f32.mrb[5].mxu0 }
 0x181   : > { %v386_v30 = vadd.f32 %v561_v18, %v385_v29 }
 0x182   : > { %450 = vst.msk [vmem:[%s794_s9 + $0x28] sm:$0xff] %vm444_vm2, %v391_v28 }
 0x183   : > { %449 = vst.msk [vmem:[%s794_s9 + $0x20] sm:$0xff] %vm444_vm2, %v386_v30 }
 0x187   : > { %v611_v31 = vpop.f32.mrb[6].mxu0 }
 0x188   : > { %v401_v32 = vadd.f32 %v611_v31, %v561_v18  ;;  %v395_v33 = vpop.f32.mrb[7].mxu0 }
 0x189   : > { %v396_v34 = vadd.f32 %v561_v18, %v395_v33 }
 0x18a   : > { %452 = vst.msk [vmem:[%s794_s9 + $0x38] sm:$0xff] %vm444_vm2, %v401_v32 }
 0x18b   : > { %451 = vst.msk [vmem:[%s794_s9 + $0x30] sm:$0xff] %vm444_vm2, %v396_v34 }
 0x18f   : > { %v614_v35 = vpop.f32.mrb[0].mxu1 }
 0x190   : > { %v411_v36 = vadd.f32 %v614_v35, %v561_v18  ;;  %v405_v37 = vpop.f32.mrb[1].mxu1 }
 0x191   : > { %v406_v38 = vadd.f32 %v561_v18, %v405_v37 }
 0x192   : > { %454 = vst.msk [vmem:[%s794_s9 + $0x48] sm:$0xff] %vm444_vm2, %v411_v36 }
 0x193   : > { %453 = vst.msk [vmem:[%s794_s9 + $0x40] sm:$0xff] %vm444_vm2, %v406_v38 }
 0x197   : > { %v617_v39 = vpop.f32.mrb[2].mxu1 }
 0x198   : > { %v421_v40 = vadd.f32 %v617_v39, %v561_v18  ;;  %v415_v41 = vpop.f32.mrb[3].mxu1 }
 0x199   : > { %v416_v42 = vadd.f32 %v561_v18, %v415_v41 }
 0x19a   : > { %456 = vst.msk [vmem:[%s794_s9 + $0x58] sm:$0xff] %vm444_vm2, %v421_v40 }
 0x19b   : > { %455 = vst.msk [vmem:[%s794_s9 + $0x50] sm:$0xff] %vm444_vm2, %v416_v42 }
 0x19f   : > { %v620_v43 = vpop.f32.mrb[4].mxu1 }
 0x1a0   : > { %v431_v44 = vadd.f32 %v620_v43, %v561_v18  ;;  %v425_v45 = vpop.f32.mrb[5].mxu1 }
 0x1a1   : > { %v426_v46 = vadd.f32 %v561_v18, %v425_v45 }
 0x1a2   : > { %458 = vst.msk [vmem:[%s794_s9 + $0x68] sm:$0xff] %vm444_vm2, %v431_v44 }
 0x1a3   : > { %457 = vst.msk [vmem:[%s794_s9 + $0x60] sm:$0xff] %vm444_vm2, %v426_v46 }
 0x1a7   : > { %v623_v47 = vpop.f32.mrb[6].mxu1 }
 0x1a8   : > { %v441_v48 = vadd.f32 %v623_v47, %v561_v18  ;;  %v435_v49 = vpop.f32.mrb[7].mxu1 }
 0x1a9   : > { %v436_v50 = vadd.f32 %v561_v18, %v435_v49 }
 0x1aa   : > { %460 = vst.msk [vmem:[%s794_s9 + $0x78] sm:$0xff] %vm444_vm2, %v441_v48 }
 0x1ab   : > { %459 = vst.msk [vmem:[%s794_s9 + $0x70] sm:$0xff] %vm444_vm2, %v436_v50 }
 0x1ac PF: > { %s13_s16 = sadd.s32 1, %s705_s16   ;;  %s847_s12 = smov %s697_s14 }
 0x1ad   : > { %p10_p8 = scmp.ge.s32.totalorder %s13_s16, 6   ;;  %s848_s13 = smov %s701_s15 }
 0x1ae   : > { %s849_s14 = smov %s852_s17  ;;  %s850_s15 = smov %s856_s18 }
 0x1af   :  { %12 = sbr.rel (!%p10_p8) target bundleno = 3 (0x3), region = 62 }

</bundles_post_ra>
